<compile_context>
chip_gen: v5e
topology: v5e:2x2
jax: 0.10.0
libtpu: 0.0.40
codegen_flags: <defaults>
</compile_context>

<pallas_src>
import jax
import jax.numpy as jnp
from jax.experimental import pallas as pl
from jax.experimental.pallas import tpu as pltpu


def rr_kernel(scn_ref, mask_ref, lrn_static_ref, cpt_t_ref,
              wih_ref, whh_ref, bih_ref, bhh_ref,
              rhs_s_ref, rhs_d_ref, cpt_lmd_ref,
              r_ref, h_lrn_ref, h_cpt_ref,
              gi_ref):
    TB, E = scn_ref.shape
    B = r_ref.shape[0]
    T = TB // B
    H = h_lrn_ref.shape[1]

    def dot(a, b):
        return jnp.dot(a, b, preferred_element_type=jnp.float32)

    # ---- prologue: hoist all input-to-hidden projections out of the recurrence ----
    x_all = scn_ref[...] * mask_ref[...]                      # (T*B, E), time-major rows
    gi_ref[...] = dot(x_all, wih_ref[...]) + bih_ref[...]     # (T*B, 3E) = [r | z | n]

    # ---- GRU recurrence (PyTorch nn.GRU semantics): 1 fused hidden matmul / step ----
    def step(t, h):
        off = pl.multiple_of(t * B, B)
        gi_t = gi_ref[pl.ds(off, B), :]                       # (B, 3E)
        gh = dot(h, whh_ref[...]) + bhh_ref[...]              # (B, 3E)
        r_g = jax.nn.sigmoid(gi_t[:, :E] + gh[:, :E])
        z_g = jax.nn.sigmoid(gi_t[:, E:2 * E] + gh[:, E:2 * E])
        n_g = jnp.tanh(gi_t[:, 2 * E:] + r_g * gh[:, 2 * E:])
        return (1.0 - z_g) * n_g + z_g * h

    h0 = jnp.zeros((B, E), jnp.float32)
    h_last = jax.lax.fori_loop(0, T, step, h0, unroll=True)   # lrn_dynamic: (B, E)

    # ---- head ----
    # rhs = concat([lrn_lmd, w], axis=1) pre-split (in the wrapper) into the rows
    # that multiply lrn_static and the rows that multiply lrn_dynamic.
    hw = dot(lrn_static_ref[...], rhs_s_ref[...]) + dot(h_last, rhs_d_ref[...])  # (B, H+E)
    h_lrn = hw[:, :H]                                         # lrn @ lrn_lmd
    mid = hw[:, H:]                                           # lrn @ w
    cpt_t = cpt_t_ref[...]                                    # (E, Nc)
    h_cpt = dot(cpt_lmd_ref[...], cpt_t)                      # (H, Nc)

    r_ref[...] = dot(h_lrn, h_cpt) + dot(mid, cpt_t)          # h + temp_
    h_lrn_ref[...] = h_lrn
    h_cpt_ref[...] = h_cpt


def rr_forward(params, lrn_static, scn_dynamic, scn_seq_index, scn_seq_mask, cpt_static):
    """Pallas-backed RR.forward. Returns (r, h_lrn, h_cpt)."""
    B, T = scn_seq_index.shape
    E = lrn_static.shape[1]
    H = params["lrn_lmd"].shape[1]
    Nc = cpt_static.shape[0]

    # glue: gather + time-major flatten + parameter repacking (done once, outside kernel)
    scn_record = scn_dynamic[scn_seq_index]                                         # (B, T, E)
    scn_flat = jnp.transpose(scn_record, (1, 0, 2)).reshape(T * B, E).astype(jnp.float32)
    mask_flat = jnp.transpose(scn_seq_mask.astype(jnp.float32), (1, 0)).reshape(T * B, 1)
    cpt_t = cpt_static.T.astype(jnp.float32)                                        # (E, Nc)

    wih = params["w_ih"].T.astype(jnp.float32)                 # (E, 3E) = [W_ir|W_iz|W_in]^T
    whh = params["w_hh"].T.astype(jnp.float32)                 # (E, 3E)
    bih = params["b_ih"].astype(jnp.float32)[None, :]          # (1, 3E)
    bhh = params["b_hh"].astype(jnp.float32)[None, :]          # (1, 3E)

    rhs = jnp.concatenate([params["lrn_lmd"], params["w"]], axis=1).astype(jnp.float32)  # (2E, H+E)
    rhs_s, rhs_d = rhs[:E], rhs[E:]

    vmem = pl.BlockSpec(memory_space=pltpu.MemorySpace.VMEM)
    n_in = 11

    return pl.pallas_call(
        rr_kernel,
        out_shape=(jax.ShapeDtypeStruct((B, Nc), jnp.float32),
                   jax.ShapeDtypeStruct((B, H), jnp.float32),
                   jax.ShapeDtypeStruct((H, Nc), jnp.float32)),
        in_specs=[vmem] * n_in,
        out_specs=(vmem, vmem, vmem),
        scratch_shapes=[pltpu.VMEM((T * B, 3 * E), jnp.float32)],
    )(scn_flat, mask_flat, lrn_static.astype(jnp.float32), cpt_t,
      wih, whh, bih, bhh, rhs_s, rhs_d, params["cpt_lmd"].astype(jnp.float32))


def rr_reference(params, lrn_static, scn_dynamic, scn_seq_index, scn_seq_mask, cpt_static):
    """Pure-JAX reference mirroring the PyTorch forward."""
    E = lrn_static.shape[1]
    scn_record = scn_dynamic[scn_seq_index] * scn_seq_mask[..., None]
    B, T, _ = scn_record.shape
    w_ih, w_hh, b_ih, b_hh = params["w_ih"], params["w_hh"], params["b_ih"], params["b_hh"]
    h = jnp.zeros((B, E), jnp.float32)
    for t in range(T):
        x = scn_record[:, t, :]
        gi = x @ w_ih.T + b_ih
        gh = h @ w_hh.T + b_hh
        r = jax.nn.sigmoid(gi[:, :E] + gh[:, :E])
        z = jax.nn.sigmoid(gi[:, E:2 * E] + gh[:, E:2 * E])
        n = jnp.tanh(gi[:, 2 * E:] + r * gh[:, 2 * E:])
        h = (1.0 - z) * n + z * h
    lrn = jnp.concatenate([lrn_static, h], axis=1)
    h_lrn = lrn @ params["lrn_lmd"]
    h_cpt = params["cpt_lmd"] @ cpt_static.T
    hh = h_lrn @ h_cpt
    temp_ = lrn @ params["w"] @ cpt_static.T
    return hh + temp_, h_lrn, h_cpt


def xavier_uniform(key, shape):
    fan_in, fan_out = shape[0], shape[1]
    bound = (6.0 / (fan_in + fan_out)) ** 0.5
    return jax.random.uniform(key, shape, jnp.float32, -bound, bound)


def init_params(key, embedding_dim, hidden_dim):
    E, H = embedding_dim, hidden_dim
    ks = jax.random.split(key, 7)
    k_gru = 1.0 / (E ** 0.5)  # PyTorch GRU default init: U(-1/sqrt(H), 1/sqrt(H))
    return {
        "w_ih": jax.random.uniform(ks[0], (3 * E, E), jnp.float32, -k_gru, k_gru),
        "w_hh": jax.random.uniform(ks[1], (3 * E, E), jnp.float32, -k_gru, k_gru),
        "b_ih": jax.random.uniform(ks[2], (3 * E,), jnp.float32, -k_gru, k_gru),
        "b_hh": jax.random.uniform(ks[3], (3 * E,), jnp.float32, -k_gru, k_gru),
        "w": xavier_uniform(ks[4], (2 * E, E)),
        "lrn_lmd": xavier_uniform(ks[5], (2 * E, H)),
        "cpt_lmd": xavier_uniform(ks[6], (H, E)),
    }


if __name__ == "__main__":
    E, H = 32, 16          # embedding_dim, hidden_dim
    B, T = 2, 8            # batch, sequence length
    NUM_SCN, NUM_CPT = 10, 6

    root = jax.random.PRNGKey(0)
    kp, k1, k2, k3, k4, k5 = jax.random.split(root, 6)
    params = init_params(kp, E, H)

    lrn_static = jax.random.normal(k1, (B, E), jnp.float32)
    scn_dynamic = jax.random.normal(k2, (NUM_SCN, E), jnp.float32)
    scn_seq_index = jax.random.randint(k3, (B, T), 0, NUM_SCN)
    scn_seq_mask = (jax.random.uniform(k4, (B, T)) > 0.3).astype(jnp.float32)
    cpt_static = jax.random.normal(k5, (NUM_CPT, E), jnp.float32)

    r, h_lrn, h_cpt = rr_forward(params, lrn_static, scn_dynamic,
                                 scn_seq_index, scn_seq_mask, cpt_static)
    jax.block_until_ready((r, h_lrn, h_cpt))

    r_ref, h_lrn_ref, h_cpt_ref = rr_reference(params, lrn_static, scn_dynamic,
                                               scn_seq_index, scn_seq_mask, cpt_static)
    assert jnp.allclose(r, r_ref, rtol=1e-4, atol=1e-4)
    assert jnp.allclose(h_lrn, h_lrn_ref, rtol=1e-4, atol=1e-4)
    assert jnp.allclose(h_cpt, h_cpt_ref, rtol=1e-4, atol=1e-4)

    print("KERNEL_OK")
</pallas_src>

<mosaic_0001>
module attributes {stable_mosaic.version = 11 : i64} {
  func.func @rr_kernel(%arg0: memref<16x32xf32, #tpu.memory_space<vmem>>, %arg1: memref<16x1xf32, #tpu.memory_space<vmem>>, %arg2: memref<2x32xf32, #tpu.memory_space<vmem>>, %arg3: memref<32x6xf32, #tpu.memory_space<vmem>>, %arg4: memref<32x96xf32, #tpu.memory_space<vmem>>, %arg5: memref<32x96xf32, #tpu.memory_space<vmem>>, %arg6: memref<1x96xf32, #tpu.memory_space<vmem>>, %arg7: memref<1x96xf32, #tpu.memory_space<vmem>>, %arg8: memref<32x48xf32, #tpu.memory_space<vmem>>, %arg9: memref<32x48xf32, #tpu.memory_space<vmem>>, %arg10: memref<16x32xf32, #tpu.memory_space<vmem>>, %arg11: memref<2x6xf32, #tpu.memory_space<vmem>>, %arg12: memref<2x16xf32, #tpu.memory_space<vmem>>, %arg13: memref<16x6xf32, #tpu.memory_space<vmem>>, %arg14: memref<16x96xf32, #tpu.memory_space<vmem>>) attributes {dimension_semantics = [], scalar_prefetch = 0 : i64, scratch_operands = 1 : i64, tpu.core_type = #tpu.core_type<tc>} {
    %c0 = arith.constant 0 : index
    %c0_0 = arith.constant 0 : index
    %0 = vector.load %arg0[%c0, %c0_0] : memref<16x32xf32, #tpu.memory_space<vmem>>, vector<16x32xf32>
    %c0_1 = arith.constant 0 : index
    %c0_2 = arith.constant 0 : index
    %1 = vector.load %arg1[%c0_1, %c0_2] : memref<16x1xf32, #tpu.memory_space<vmem>>, vector<16x1xf32>
    %2 = vector.broadcast %1 : vector<16x1xf32> to vector<16x32xf32>
    %3 = arith.mulf %0, %2 : vector<16x32xf32>
    %c0_3 = arith.constant 0 : index
    %c0_4 = arith.constant 0 : index
    %4 = vector.load %arg4[%c0_3, %c0_4] : memref<32x96xf32, #tpu.memory_space<vmem>>, vector<32x96xf32>
    %cst = arith.constant dense<0.000000e+00> : vector<16x96xf32>
    %5 = tpu.matmul %3, %4, %cst {dimension_numbers = #tpu.dot_dimension_numbers<[1], [0], [0], [1], [0, 0, 1, 1], [], []>} : vector<16x32xf32>, vector<32x96xf32>, vector<16x96xf32> -> vector<16x96xf32>
    %c0_5 = arith.constant 0 : index
    %c0_6 = arith.constant 0 : index
    %6 = vector.load %arg6[%c0_5, %c0_6] : memref<1x96xf32, #tpu.memory_space<vmem>>, vector<1x96xf32>
    %7 = vector.broadcast %6 : vector<1x96xf32> to vector<16x96xf32>
    %8 = arith.addf %5, %7 : vector<16x96xf32>
    %c0_7 = arith.constant 0 : index
    %c0_8 = arith.constant 0 : index
    %9 = vector.load %arg14[%c0_7, %c0_8] : memref<16x96xf32, #tpu.memory_space<vmem>>, vector<16x96xf32>
    tpu.vector_store %arg14[%c0_7, %c0_8], %8 {strides = array<i32>} : memref<16x96xf32, #tpu.memory_space<vmem>>, vector<16x96xf32>,
    %cst_9 = arith.constant 0.000000e+00 : f32
    %10 = vector.broadcast %cst_9 : f32 to vector<2x32xf32>
    %c0_i32 = arith.constant 0 : i32
    %c2_i32 = arith.constant 2 : i32
    %11 = arith.muli %c0_i32, %c2_i32 : i32
    %12 = tpu.assume_multiple %11, 2 : i32
    %13 = arith.index_cast %12 : i32 to index
    %c0_10 = arith.constant 0 : index
    %14 = vector.load %arg14[%13, %c0_10] : memref<16x96xf32, #tpu.memory_space<vmem>>, vector<2x96xf32>
    %c0_11 = arith.constant 0 : index
    %c0_12 = arith.constant 0 : index
    %15 = vector.load %arg5[%c0_11, %c0_12] : memref<32x96xf32, #tpu.memory_space<vmem>>, vector<32x96xf32>
    %cst_13 = arith.constant dense<0.000000e+00> : vector<2x96xf32>
    %16 = tpu.matmul %10, %15, %cst_13 {dimension_numbers = #tpu.dot_dimension_numbers<[1], [0], [0], [1], [0, 0, 1, 1], [], []>} : vector<2x32xf32>, vector<32x96xf32>, vector<2x96xf32> -> vector<2x96xf32>
    %c0_14 = arith.constant 0 : index
    %c0_15 = arith.constant 0 : index
    %17 = vector.load %arg7[%c0_14, %c0_15] : memref<1x96xf32, #tpu.memory_space<vmem>>, vector<1x96xf32>
    %18 = vector.broadcast %17 : vector<1x96xf32> to vector<2x96xf32>
    %19 = arith.addf %16, %18 : vector<2x96xf32>
    %20 = vector.extract_strided_slice %14 {offsets = [0, 0], sizes = [2, 32], strides = [1, 1]} : vector<2x96xf32> to vector<2x32xf32>
    %21 = vector.extract_strided_slice %19 {offsets = [0, 0], sizes = [2, 32], strides = [1, 1]} : vector<2x96xf32> to vector<2x32xf32>
    %22 = arith.addf %20, %21 : vector<2x32xf32>
    %23 = arith.negf %22 : vector<2x32xf32>
    %24 = math.exp %23 : vector<2x32xf32>
    %cst_16 = arith.constant 1.000000e+00 : f32
    %25 = vector.broadcast %cst_16 : f32 to vector<2x32xf32>
    %26 = arith.addf %25, %24 : vector<2x32xf32>
    %27 = arith.divf %25, %26 : vector<2x32xf32>
    %28 = vector.extract_strided_slice %14 {offsets = [0, 32], sizes = [2, 32], strides = [1, 1]} : vector<2x96xf32> to vector<2x32xf32>
    %29 = vector.extract_strided_slice %19 {offsets = [0, 32], sizes = [2, 32], strides = [1, 1]} : vector<2x96xf32> to vector<2x32xf32>
    %30 = arith.addf %28, %29 : vector<2x32xf32>
    %31 = arith.negf %30 : vector<2x32xf32>
    %32 = math.exp %31 : vector<2x32xf32>
    %cst_17 = arith.constant 1.000000e+00 : f32
    %33 = vector.broadcast %cst_17 : f32 to vector<2x32xf32>
    %34 = arith.addf %33, %32 : vector<2x32xf32>
    %35 = arith.divf %33, %34 : vector<2x32xf32>
    %36 = vector.extract_strided_slice %14 {offsets = [0, 64], sizes = [2, 32], strides = [1, 1]} : vector<2x96xf32> to vector<2x32xf32>
    %37 = vector.extract_strided_slice %19 {offsets = [0, 64], sizes = [2, 32], strides = [1, 1]} : vector<2x96xf32> to vector<2x32xf32>
    %38 = arith.mulf %27, %37 : vector<2x32xf32>
    %39 = arith.addf %36, %38 : vector<2x32xf32>
    %40 = math.tanh %39 : vector<2x32xf32>
    %cst_18 = arith.constant 1.000000e+00 : f32
    %41 = vector.broadcast %cst_18 : f32 to vector<2x32xf32>
    %42 = arith.subf %41, %35 : vector<2x32xf32>
    %43 = arith.mulf %42, %40 : vector<2x32xf32>
    %44 = arith.mulf %35, %10 : vector<2x32xf32>
    %45 = arith.addf %43, %44 : vector<2x32xf32>
    %c1_i32 = arith.constant 1 : i32
    %c2_i32_19 = arith.constant 2 : i32
    %46 = arith.muli %c1_i32, %c2_i32_19 : i32
    %47 = tpu.assume_multiple %46, 2 : i32
    %48 = arith.index_cast %47 : i32 to index
    %c0_20 = arith.constant 0 : index
    %49 = vector.load %arg14[%48, %c0_20] : memref<16x96xf32, #tpu.memory_space<vmem>>, vector<2x96xf32>
    %c0_21 = arith.constant 0 : index
    %c0_22 = arith.constant 0 : index
    %50 = vector.load %arg5[%c0_21, %c0_22] : memref<32x96xf32, #tpu.memory_space<vmem>>, vector<32x96xf32>
    %cst_23 = arith.constant dense<0.000000e+00> : vector<2x96xf32>
    %51 = tpu.matmul %45, %50, %cst_23 {dimension_numbers = #tpu.dot_dimension_numbers<[1], [0], [0], [1], [0, 0, 1, 1], [], []>} : vector<2x32xf32>, vector<32x96xf32>, vector<2x96xf32> -> vector<2x96xf32>
    %c0_24 = arith.constant 0 : index
    %c0_25 = arith.constant 0 : index
    %52 = vector.load %arg7[%c0_24, %c0_25] : memref<1x96xf32, #tpu.memory_space<vmem>>, vector<1x96xf32>
    %53 = vector.broadcast %52 : vector<1x96xf32> to vector<2x96xf32>
    %54 = arith.addf %51, %53 : vector<2x96xf32>
    %55 = vector.extract_strided_slice %49 {offsets = [0, 0], sizes = [2, 32], strides = [1, 1]} : vector<2x96xf32> to vector<2x32xf32>
    %56 = vector.extract_strided_slice %54 {offsets = [0, 0], sizes = [2, 32], strides = [1, 1]} : vector<2x96xf32> to vector<2x32xf32>
    %57 = arith.addf %55, %56 : vector<2x32xf32>
    %58 = arith.negf %57 : vector<2x32xf32>
    %59 = math.exp %58 : vector<2x32xf32>
    %cst_26 = arith.constant 1.000000e+00 : f32
    %60 = vector.broadcast %cst_26 : f32 to vector<2x32xf32>
    %61 = arith.addf %60, %59 : vector<2x32xf32>
    %62 = arith.divf %60, %61 : vector<2x32xf32>
    %63 = vector.extract_strided_slice %49 {offsets = [0, 32], sizes = [2, 32], strides = [1, 1]} : vector<2x96xf32> to vector<2x32xf32>
    %64 = vector.extract_strided_slice %54 {offsets = [0, 32], sizes = [2, 32], strides = [1, 1]} : vector<2x96xf32> to vector<2x32xf32>
    %65 = arith.addf %63, %64 : vector<2x32xf32>
    %66 = arith.negf %65 : vector<2x32xf32>
    %67 = math.exp %66 : vector<2x32xf32>
    %cst_27 = arith.constant 1.000000e+00 : f32
    %68 = vector.broadcast %cst_27 : f32 to vector<2x32xf32>
    %69 = arith.addf %68, %67 : vector<2x32xf32>
    %70 = arith.divf %68, %69 : vector<2x32xf32>
    %71 = vector.extract_strided_slice %49 {offsets = [0, 64], sizes = [2, 32], strides = [1, 1]} : vector<2x96xf32> to vector<2x32xf32>
    %72 = vector.extract_strided_slice %54 {offsets = [0, 64], sizes = [2, 32], strides = [1, 1]} : vector<2x96xf32> to vector<2x32xf32>
    %73 = arith.mulf %62, %72 : vector<2x32xf32>
    %74 = arith.addf %71, %73 : vector<2x32xf32>
    %75 = math.tanh %74 : vector<2x32xf32>
    %cst_28 = arith.constant 1.000000e+00 : f32
    %76 = vector.broadcast %cst_28 : f32 to vector<2x32xf32>
    %77 = arith.subf %76, %70 : vector<2x32xf32>
    %78 = arith.mulf %77, %75 : vector<2x32xf32>
    %79 = arith.mulf %70, %45 : vector<2x32xf32>
    %80 = arith.addf %78, %79 : vector<2x32xf32>
    %c2_i32_29 = arith.constant 2 : i32
    %c2_i32_30 = arith.constant 2 : i32
    %81 = arith.muli %c2_i32_29, %c2_i32_30 : i32
    %82 = tpu.assume_multiple %81, 2 : i32
    %83 = arith.index_cast %82 : i32 to index
    %c0_31 = arith.constant 0 : index
    %84 = vector.load %arg14[%83, %c0_31] : memref<16x96xf32, #tpu.memory_space<vmem>>, vector<2x96xf32>
    %c0_32 = arith.constant 0 : index
    %c0_33 = arith.constant 0 : index
    %85 = vector.load %arg5[%c0_32, %c0_33] : memref<32x96xf32, #tpu.memory_space<vmem>>, vector<32x96xf32>
    %cst_34 = arith.constant dense<0.000000e+00> : vector<2x96xf32>
    %86 = tpu.matmul %80, %85, %cst_34 {dimension_numbers = #tpu.dot_dimension_numbers<[1], [0], [0], [1], [0, 0, 1, 1], [], []>} : vector<2x32xf32>, vector<32x96xf32>, vector<2x96xf32> -> vector<2x96xf32>
    %c0_35 = arith.constant 0 : index
    %c0_36 = arith.constant 0 : index
    %87 = vector.load %arg7[%c0_35, %c0_36] : memref<1x96xf32, #tpu.memory_space<vmem>>, vector<1x96xf32>
    %88 = vector.broadcast %87 : vector<1x96xf32> to vector<2x96xf32>
    %89 = arith.addf %86, %88 : vector<2x96xf32>
    %90 = vector.extract_strided_slice %84 {offsets = [0, 0], sizes = [2, 32], strides = [1, 1]} : vector<2x96xf32> to vector<2x32xf32>
    %91 = vector.extract_strided_slice %89 {offsets = [0, 0], sizes = [2, 32], strides = [1, 1]} : vector<2x96xf32> to vector<2x32xf32>
    %92 = arith.addf %90, %91 : vector<2x32xf32>
    %93 = arith.negf %92 : vector<2x32xf32>
    %94 = math.exp %93 : vector<2x32xf32>
    %cst_37 = arith.constant 1.000000e+00 : f32
    %95 = vector.broadcast %cst_37 : f32 to vector<2x32xf32>
    %96 = arith.addf %95, %94 : vector<2x32xf32>
    %97 = arith.divf %95, %96 : vector<2x32xf32>
    %98 = vector.extract_strided_slice %84 {offsets = [0, 32], sizes = [2, 32], strides = [1, 1]} : vector<2x96xf32> to vector<2x32xf32>
    %99 = vector.extract_strided_slice %89 {offsets = [0, 32], sizes = [2, 32], strides = [1, 1]} : vector<2x96xf32> to vector<2x32xf32>
    %100 = arith.addf %98, %99 : vector<2x32xf32>
    %101 = arith.negf %100 : vector<2x32xf32>
    %102 = math.exp %101 : vector<2x32xf32>
    %cst_38 = arith.constant 1.000000e+00 : f32
    %103 = vector.broadcast %cst_38 : f32 to vector<2x32xf32>
    %104 = arith.addf %103, %102 : vector<2x32xf32>
    %105 = arith.divf %103, %104 : vector<2x32xf32>
    %106 = vector.extract_strided_slice %84 {offsets = [0, 64], sizes = [2, 32], strides = [1, 1]} : vector<2x96xf32> to vector<2x32xf32>
    %107 = vector.extract_strided_slice %89 {offsets = [0, 64], sizes = [2, 32], strides = [1, 1]} : vector<2x96xf32> to vector<2x32xf32>
    %108 = arith.mulf %97, %107 : vector<2x32xf32>
    %109 = arith.addf %106, %108 : vector<2x32xf32>
    %110 = math.tanh %109 : vector<2x32xf32>
    %cst_39 = arith.constant 1.000000e+00 : f32
    %111 = vector.broadcast %cst_39 : f32 to vector<2x32xf32>
    %112 = arith.subf %111, %105 : vector<2x32xf32>
    %113 = arith.mulf %112, %110 : vector<2x32xf32>
    %114 = arith.mulf %105, %80 : vector<2x32xf32>
    %115 = arith.addf %113, %114 : vector<2x32xf32>
    %c3_i32 = arith.constant 3 : i32
    %c2_i32_40 = arith.constant 2 : i32
    %116 = arith.muli %c3_i32, %c2_i32_40 : i32
    %117 = tpu.assume_multiple %116, 2 : i32
    %118 = arith.index_cast %117 : i32 to index
    %c0_41 = arith.constant 0 : index
    %119 = vector.load %arg14[%118, %c0_41] : memref<16x96xf32, #tpu.memory_space<vmem>>, vector<2x96xf32>
    %c0_42 = arith.constant 0 : index
    %c0_43 = arith.constant 0 : index
    %120 = vector.load %arg5[%c0_42, %c0_43] : memref<32x96xf32, #tpu.memory_space<vmem>>, vector<32x96xf32>
    %cst_44 = arith.constant dense<0.000000e+00> : vector<2x96xf32>
    %121 = tpu.matmul %115, %120, %cst_44 {dimension_numbers = #tpu.dot_dimension_numbers<[1], [0], [0], [1], [0, 0, 1, 1], [], []>} : vector<2x32xf32>, vector<32x96xf32>, vector<2x96xf32> -> vector<2x96xf32>
    %c0_45 = arith.constant 0 : index
    %c0_46 = arith.constant 0 : index
    %122 = vector.load %arg7[%c0_45, %c0_46] : memref<1x96xf32, #tpu.memory_space<vmem>>, vector<1x96xf32>
    %123 = vector.broadcast %122 : vector<1x96xf32> to vector<2x96xf32>
    %124 = arith.addf %121, %123 : vector<2x96xf32>
    %125 = vector.extract_strided_slice %119 {offsets = [0, 0], sizes = [2, 32], strides = [1, 1]} : vector<2x96xf32> to vector<2x32xf32>
    %126 = vector.extract_strided_slice %124 {offsets = [0, 0], sizes = [2, 32], strides = [1, 1]} : vector<2x96xf32> to vector<2x32xf32>
    %127 = arith.addf %125, %126 : vector<2x32xf32>
    %128 = arith.negf %127 : vector<2x32xf32>
    %129 = math.exp %128 : vector<2x32xf32>
    %cst_47 = arith.constant 1.000000e+00 : f32
    %130 = vector.broadcast %cst_47 : f32 to vector<2x32xf32>
    %131 = arith.addf %130, %129 : vector<2x32xf32>
    %132 = arith.divf %130, %131 : vector<2x32xf32>
    %133 = vector.extract_strided_slice %119 {offsets = [0, 32], sizes = [2, 32], strides = [1, 1]} : vector<2x96xf32> to vector<2x32xf32>
    %134 = vector.extract_strided_slice %124 {offsets = [0, 32], sizes = [2, 32], strides = [1, 1]} : vector<2x96xf32> to vector<2x32xf32>
    %135 = arith.addf %133, %134 : vector<2x32xf32>
    %136 = arith.negf %135 : vector<2x32xf32>
    %137 = math.exp %136 : vector<2x32xf32>
    %cst_48 = arith.constant 1.000000e+00 : f32
    %138 = vector.broadcast %cst_48 : f32 to vector<2x32xf32>
    %139 = arith.addf %138, %137 : vector<2x32xf32>
    %140 = arith.divf %138, %139 : vector<2x32xf32>
    %141 = vector.extract_strided_slice %119 {offsets = [0, 64], sizes = [2, 32], strides = [1, 1]} : vector<2x96xf32> to vector<2x32xf32>
    %142 = vector.extract_strided_slice %124 {offsets = [0, 64], sizes = [2, 32], strides = [1, 1]} : vector<2x96xf32> to vector<2x32xf32>
    %143 = arith.mulf %132, %142 : vector<2x32xf32>
    %144 = arith.addf %141, %143 : vector<2x32xf32>
    %145 = math.tanh %144 : vector<2x32xf32>
    %cst_49 = arith.constant 1.000000e+00 : f32
    %146 = vector.broadcast %cst_49 : f32 to vector<2x32xf32>
    %147 = arith.subf %146, %140 : vector<2x32xf32>
    %148 = arith.mulf %147, %145 : vector<2x32xf32>
    %149 = arith.mulf %140, %115 : vector<2x32xf32>
    %150 = arith.addf %148, %149 : vector<2x32xf32>
    %c4_i32 = arith.constant 4 : i32
    %c2_i32_50 = arith.constant 2 : i32
    %151 = arith.muli %c4_i32, %c2_i32_50 : i32
    %152 = tpu.assume_multiple %151, 2 : i32
    %153 = arith.index_cast %152 : i32 to index
    %c0_51 = arith.constant 0 : index
    %154 = vector.load %arg14[%153, %c0_51] : memref<16x96xf32, #tpu.memory_space<vmem>>, vector<2x96xf32>
    %c0_52 = arith.constant 0 : index
    %c0_53 = arith.constant 0 : index
    %155 = vector.load %arg5[%c0_52, %c0_53] : memref<32x96xf32, #tpu.memory_space<vmem>>, vector<32x96xf32>
    %cst_54 = arith.constant dense<0.000000e+00> : vector<2x96xf32>
    %156 = tpu.matmul %150, %155, %cst_54 {dimension_numbers = #tpu.dot_dimension_numbers<[1], [0], [0], [1], [0, 0, 1, 1], [], []>} : vector<2x32xf32>, vector<32x96xf32>, vector<2x96xf32> -> vector<2x96xf32>
    %c0_55 = arith.constant 0 : index
    %c0_56 = arith.constant 0 : index
    %157 = vector.load %arg7[%c0_55, %c0_56] : memref<1x96xf32, #tpu.memory_space<vmem>>, vector<1x96xf32>
    %158 = vector.broadcast %157 : vector<1x96xf32> to vector<2x96xf32>
    %159 = arith.addf %156, %158 : vector<2x96xf32>
    %160 = vector.extract_strided_slice %154 {offsets = [0, 0], sizes = [2, 32], strides = [1, 1]} : vector<2x96xf32> to vector<2x32xf32>
    %161 = vector.extract_strided_slice %159 {offsets = [0, 0], sizes = [2, 32], strides = [1, 1]} : vector<2x96xf32> to vector<2x32xf32>
    %162 = arith.addf %160, %161 : vector<2x32xf32>
    %163 = arith.negf %162 : vector<2x32xf32>
    %164 = math.exp %163 : vector<2x32xf32>
    %cst_57 = arith.constant 1.000000e+00 : f32
    %165 = vector.broadcast %cst_57 : f32 to vector<2x32xf32>
    %166 = arith.addf %165, %164 : vector<2x32xf32>
    %167 = arith.divf %165, %166 : vector<2x32xf32>
    %168 = vector.extract_strided_slice %154 {offsets = [0, 32], sizes = [2, 32], strides = [1, 1]} : vector<2x96xf32> to vector<2x32xf32>
    %169 = vector.extract_strided_slice %159 {offsets = [0, 32], sizes = [2, 32], strides = [1, 1]} : vector<2x96xf32> to vector<2x32xf32>
    %170 = arith.addf %168, %169 : vector<2x32xf32>
    %171 = arith.negf %170 : vector<2x32xf32>
    %172 = math.exp %171 : vector<2x32xf32>
    %cst_58 = arith.constant 1.000000e+00 : f32
    %173 = vector.broadcast %cst_58 : f32 to vector<2x32xf32>
    %174 = arith.addf %173, %172 : vector<2x32xf32>
    %175 = arith.divf %173, %174 : vector<2x32xf32>
    %176 = vector.extract_strided_slice %154 {offsets = [0, 64], sizes = [2, 32], strides = [1, 1]} : vector<2x96xf32> to vector<2x32xf32>
    %177 = vector.extract_strided_slice %159 {offsets = [0, 64], sizes = [2, 32], strides = [1, 1]} : vector<2x96xf32> to vector<2x32xf32>
    %178 = arith.mulf %167, %177 : vector<2x32xf32>
    %179 = arith.addf %176, %178 : vector<2x32xf32>
    %180 = math.tanh %179 : vector<2x32xf32>
    %cst_59 = arith.constant 1.000000e+00 : f32
    %181 = vector.broadcast %cst_59 : f32 to vector<2x32xf32>
    %182 = arith.subf %181, %175 : vector<2x32xf32>
    %183 = arith.mulf %182, %180 : vector<2x32xf32>
    %184 = arith.mulf %175, %150 : vector<2x32xf32>
    %185 = arith.addf %183, %184 : vector<2x32xf32>
    %c5_i32 = arith.constant 5 : i32
    %c2_i32_60 = arith.constant 2 : i32
    %186 = arith.muli %c5_i32, %c2_i32_60 : i32
    %187 = tpu.assume_multiple %186, 2 : i32
    %188 = arith.index_cast %187 : i32 to index
    %c0_61 = arith.constant 0 : index
    %189 = vector.load %arg14[%188, %c0_61] : memref<16x96xf32, #tpu.memory_space<vmem>>, vector<2x96xf32>
    %c0_62 = arith.constant 0 : index
    %c0_63 = arith.constant 0 : index
    %190 = vector.load %arg5[%c0_62, %c0_63] : memref<32x96xf32, #tpu.memory_space<vmem>>, vector<32x96xf32>
    %cst_64 = arith.constant dense<0.000000e+00> : vector<2x96xf32>
    %191 = tpu.matmul %185, %190, %cst_64 {dimension_numbers = #tpu.dot_dimension_numbers<[1], [0], [0], [1], [0, 0, 1, 1], [], []>} : vector<2x32xf32>, vector<32x96xf32>, vector<2x96xf32> -> vector<2x96xf32>
    %c0_65 = arith.constant 0 : index
    %c0_66 = arith.constant 0 : index
    %192 = vector.load %arg7[%c0_65, %c0_66] : memref<1x96xf32, #tpu.memory_space<vmem>>, vector<1x96xf32>
    %193 = vector.broadcast %192 : vector<1x96xf32> to vector<2x96xf32>
    %194 = arith.addf %191, %193 : vector<2x96xf32>
    %195 = vector.extract_strided_slice %189 {offsets = [0, 0], sizes = [2, 32], strides = [1, 1]} : vector<2x96xf32> to vector<2x32xf32>
    %196 = vector.extract_strided_slice %194 {offsets = [0, 0], sizes = [2, 32], strides = [1, 1]} : vector<2x96xf32> to vector<2x32xf32>
    %197 = arith.addf %195, %196 : vector<2x32xf32>
    %198 = arith.negf %197 : vector<2x32xf32>
    %199 = math.exp %198 : vector<2x32xf32>
    %cst_67 = arith.constant 1.000000e+00 : f32
    %200 = vector.broadcast %cst_67 : f32 to vector<2x32xf32>
    %201 = arith.addf %200, %199 : vector<2x32xf32>
    %202 = arith.divf %200, %201 : vector<2x32xf32>
    %203 = vector.extract_strided_slice %189 {offsets = [0, 32], sizes = [2, 32], strides = [1, 1]} : vector<2x96xf32> to vector<2x32xf32>
    %204 = vector.extract_strided_slice %194 {offsets = [0, 32], sizes = [2, 32], strides = [1, 1]} : vector<2x96xf32> to vector<2x32xf32>
    %205 = arith.addf %203, %204 : vector<2x32xf32>
    %206 = arith.negf %205 : vector<2x32xf32>
    %207 = math.exp %206 : vector<2x32xf32>
    %cst_68 = arith.constant 1.000000e+00 : f32
    %208 = vector.broadcast %cst_68 : f32 to vector<2x32xf32>
    %209 = arith.addf %208, %207 : vector<2x32xf32>
    %210 = arith.divf %208, %209 : vector<2x32xf32>
    %211 = vector.extract_strided_slice %189 {offsets = [0, 64], sizes = [2, 32], strides = [1, 1]} : vector<2x96xf32> to vector<2x32xf32>
    %212 = vector.extract_strided_slice %194 {offsets = [0, 64], sizes = [2, 32], strides = [1, 1]} : vector<2x96xf32> to vector<2x32xf32>
    %213 = arith.mulf %202, %212 : vector<2x32xf32>
    %214 = arith.addf %211, %213 : vector<2x32xf32>
    %215 = math.tanh %214 : vector<2x32xf32>
    %cst_69 = arith.constant 1.000000e+00 : f32
    %216 = vector.broadcast %cst_69 : f32 to vector<2x32xf32>
    %217 = arith.subf %216, %210 : vector<2x32xf32>
    %218 = arith.mulf %217, %215 : vector<2x32xf32>
    %219 = arith.mulf %210, %185 : vector<2x32xf32>
    %220 = arith.addf %218, %219 : vector<2x32xf32>
    %c6_i32 = arith.constant 6 : i32
    %c2_i32_70 = arith.constant 2 : i32
    %221 = arith.muli %c6_i32, %c2_i32_70 : i32
    %222 = tpu.assume_multiple %221, 2 : i32
    %223 = arith.index_cast %222 : i32 to index
    %c0_71 = arith.constant 0 : index
    %224 = vector.load %arg14[%223, %c0_71] : memref<16x96xf32, #tpu.memory_space<vmem>>, vector<2x96xf32>
    %c0_72 = arith.constant 0 : index
    %c0_73 = arith.constant 0 : index
    %225 = vector.load %arg5[%c0_72, %c0_73] : memref<32x96xf32, #tpu.memory_space<vmem>>, vector<32x96xf32>
    %cst_74 = arith.constant dense<0.000000e+00> : vector<2x96xf32>
    %226 = tpu.matmul %220, %225, %cst_74 {dimension_numbers = #tpu.dot_dimension_numbers<[1], [0], [0], [1], [0, 0, 1, 1], [], []>} : vector<2x32xf32>, vector<32x96xf32>, vector<2x96xf32> -> vector<2x96xf32>
    %c0_75 = arith.constant 0 : index
    %c0_76 = arith.constant 0 : index
    %227 = vector.load %arg7[%c0_75, %c0_76] : memref<1x96xf32, #tpu.memory_space<vmem>>, vector<1x96xf32>
    %228 = vector.broadcast %227 : vector<1x96xf32> to vector<2x96xf32>
    %229 = arith.addf %226, %228 : vector<2x96xf32>
    %230 = vector.extract_strided_slice %224 {offsets = [0, 0], sizes = [2, 32], strides = [1, 1]} : vector<2x96xf32> to vector<2x32xf32>
    %231 = vector.extract_strided_slice %229 {offsets = [0, 0], sizes = [2, 32], strides = [1, 1]} : vector<2x96xf32> to vector<2x32xf32>
    %232 = arith.addf %230, %231 : vector<2x32xf32>
    %233 = arith.negf %232 : vector<2x32xf32>
    %234 = math.exp %233 : vector<2x32xf32>
    %cst_77 = arith.constant 1.000000e+00 : f32
    %235 = vector.broadcast %cst_77 : f32 to vector<2x32xf32>
    %236 = arith.addf %235, %234 : vector<2x32xf32>
    %237 = arith.divf %235, %236 : vector<2x32xf32>
    %238 = vector.extract_strided_slice %224 {offsets = [0, 32], sizes = [2, 32], strides = [1, 1]} : vector<2x96xf32> to vector<2x32xf32>
    %239 = vector.extract_strided_slice %229 {offsets = [0, 32], sizes = [2, 32], strides = [1, 1]} : vector<2x96xf32> to vector<2x32xf32>
    %240 = arith.addf %238, %239 : vector<2x32xf32>
    %241 = arith.negf %240 : vector<2x32xf32>
    %242 = math.exp %241 : vector<2x32xf32>
    %cst_78 = arith.constant 1.000000e+00 : f32
    %243 = vector.broadcast %cst_78 : f32 to vector<2x32xf32>
    %244 = arith.addf %243, %242 : vector<2x32xf32>
    %245 = arith.divf %243, %244 : vector<2x32xf32>
    %246 = vector.extract_strided_slice %224 {offsets = [0, 64], sizes = [2, 32], strides = [1, 1]} : vector<2x96xf32> to vector<2x32xf32>
    %247 = vector.extract_strided_slice %229 {offsets = [0, 64], sizes = [2, 32], strides = [1, 1]} : vector<2x96xf32> to vector<2x32xf32>
    %248 = arith.mulf %237, %247 : vector<2x32xf32>
    %249 = arith.addf %246, %248 : vector<2x32xf32>
    %250 = math.tanh %249 : vector<2x32xf32>
    %cst_79 = arith.constant 1.000000e+00 : f32
    %251 = vector.broadcast %cst_79 : f32 to vector<2x32xf32>
    %252 = arith.subf %251, %245 : vector<2x32xf32>
    %253 = arith.mulf %252, %250 : vector<2x32xf32>
    %254 = arith.mulf %245, %220 : vector<2x32xf32>
    %255 = arith.addf %253, %254 : vector<2x32xf32>
    %c7_i32 = arith.constant 7 : i32
    %c2_i32_80 = arith.constant 2 : i32
    %256 = arith.muli %c7_i32, %c2_i32_80 : i32
    %257 = tpu.assume_multiple %256, 2 : i32
    %258 = arith.index_cast %257 : i32 to index
    %c0_81 = arith.constant 0 : index
    %259 = vector.load %arg14[%258, %c0_81] : memref<16x96xf32, #tpu.memory_space<vmem>>, vector<2x96xf32>
    %c0_82 = arith.constant 0 : index
    %c0_83 = arith.constant 0 : index
    %260 = vector.load %arg5[%c0_82, %c0_83] : memref<32x96xf32, #tpu.memory_space<vmem>>, vector<32x96xf32>
    %cst_84 = arith.constant dense<0.000000e+00> : vector<2x96xf32>
    %261 = tpu.matmul %255, %260, %cst_84 {dimension_numbers = #tpu.dot_dimension_numbers<[1], [0], [0], [1], [0, 0, 1, 1], [], []>} : vector<2x32xf32>, vector<32x96xf32>, vector<2x96xf32> -> vector<2x96xf32>
    %c0_85 = arith.constant 0 : index
    %c0_86 = arith.constant 0 : index
    %262 = vector.load %arg7[%c0_85, %c0_86] : memref<1x96xf32, #tpu.memory_space<vmem>>, vector<1x96xf32>
    %263 = vector.broadcast %262 : vector<1x96xf32> to vector<2x96xf32>
    %264 = arith.addf %261, %263 : vector<2x96xf32>
    %265 = vector.extract_strided_slice %259 {offsets = [0, 0], sizes = [2, 32], strides = [1, 1]} : vector<2x96xf32> to vector<2x32xf32>
    %266 = vector.extract_strided_slice %264 {offsets = [0, 0], sizes = [2, 32], strides = [1, 1]} : vector<2x96xf32> to vector<2x32xf32>
    %267 = arith.addf %265, %266 : vector<2x32xf32>
    %268 = arith.negf %267 : vector<2x32xf32>
    %269 = math.exp %268 : vector<2x32xf32>
    %cst_87 = arith.constant 1.000000e+00 : f32
    %270 = vector.broadcast %cst_87 : f32 to vector<2x32xf32>
    %271 = arith.addf %270, %269 : vector<2x32xf32>
    %272 = arith.divf %270, %271 : vector<2x32xf32>
    %273 = vector.extract_strided_slice %259 {offsets = [0, 32], sizes = [2, 32], strides = [1, 1]} : vector<2x96xf32> to vector<2x32xf32>
    %274 = vector.extract_strided_slice %264 {offsets = [0, 32], sizes = [2, 32], strides = [1, 1]} : vector<2x96xf32> to vector<2x32xf32>
    %275 = arith.addf %273, %274 : vector<2x32xf32>
    %276 = arith.negf %275 : vector<2x32xf32>
    %277 = math.exp %276 : vector<2x32xf32>
    %cst_88 = arith.constant 1.000000e+00 : f32
    %278 = vector.broadcast %cst_88 : f32 to vector<2x32xf32>
    %279 = arith.addf %278, %277 : vector<2x32xf32>
    %280 = arith.divf %278, %279 : vector<2x32xf32>
    %281 = vector.extract_strided_slice %259 {offsets = [0, 64], sizes = [2, 32], strides = [1, 1]} : vector<2x96xf32> to vector<2x32xf32>
    %282 = vector.extract_strided_slice %264 {offsets = [0, 64], sizes = [2, 32], strides = [1, 1]} : vector<2x96xf32> to vector<2x32xf32>
    %283 = arith.mulf %272, %282 : vector<2x32xf32>
    %284 = arith.addf %281, %283 : vector<2x32xf32>
    %285 = math.tanh %284 : vector<2x32xf32>
    %cst_89 = arith.constant 1.000000e+00 : f32
    %286 = vector.broadcast %cst_89 : f32 to vector<2x32xf32>
    %287 = arith.subf %286, %280 : vector<2x32xf32>
    %288 = arith.mulf %287, %285 : vector<2x32xf32>
    %289 = arith.mulf %280, %255 : vector<2x32xf32>
    %290 = arith.addf %288, %289 : vector<2x32xf32>
    %c8_i32 = arith.constant 8 : i32
    %c0_90 = arith.constant 0 : index
    %c0_91 = arith.constant 0 : index
    %291 = vector.load %arg2[%c0_90, %c0_91] : memref<2x32xf32, #tpu.memory_space<vmem>>, vector<2x32xf32>
    %c0_92 = arith.constant 0 : index
    %c0_93 = arith.constant 0 : index
    %292 = vector.load %arg8[%c0_92, %c0_93] : memref<32x48xf32, #tpu.memory_space<vmem>>, vector<32x48xf32>
    %cst_94 = arith.constant dense<0.000000e+00> : vector<2x48xf32>
    %293 = tpu.matmul %291, %292, %cst_94 {dimension_numbers = #tpu.dot_dimension_numbers<[1], [0], [0], [1], [0, 0, 1, 1], [], []>} : vector<2x32xf32>, vector<32x48xf32>, vector<2x48xf32> -> vector<2x48xf32>
    %c0_95 = arith.constant 0 : index
    %c0_96 = arith.constant 0 : index
    %294 = vector.load %arg9[%c0_95, %c0_96] : memref<32x48xf32, #tpu.memory_space<vmem>>, vector<32x48xf32>
    %cst_97 = arith.constant dense<0.000000e+00> : vector<2x48xf32>
    %295 = tpu.matmul %290, %294, %cst_97 {dimension_numbers = #tpu.dot_dimension_numbers<[1], [0], [0], [1], [0, 0, 1, 1], [], []>} : vector<2x32xf32>, vector<32x48xf32>, vector<2x48xf32> -> vector<2x48xf32>
    %296 = arith.addf %293, %295 : vector<2x48xf32>
    %297 = vector.extract_strided_slice %296 {offsets = [0, 0], sizes = [2, 16], strides = [1, 1]} : vector<2x48xf32> to vector<2x16xf32>
    %298 = vector.extract_strided_slice %296 {offsets = [0, 16], sizes = [2, 32], strides = [1, 1]} : vector<2x48xf32> to vector<2x32xf32>
    %c0_98 = arith.constant 0 : index
    %c0_99 = arith.constant 0 : index
    %299 = vector.load %arg3[%c0_98, %c0_99] : memref<32x6xf32, #tpu.memory_space<vmem>>, vector<32x6xf32>
    %c0_100 = arith.constant 0 : index
    %c0_101 = arith.constant 0 : index
    %300 = vector.load %arg10[%c0_100, %c0_101] : memref<16x32xf32, #tpu.memory_space<vmem>>, vector<16x32xf32>
    %cst_102 = arith.constant dense<0.000000e+00> : vector<16x6xf32>
    %301 = tpu.matmul %300, %299, %cst_102 {dimension_numbers = #tpu.dot_dimension_numbers<[1], [0], [0], [1], [0, 0, 1, 1], [], []>} : vector<16x32xf32>, vector<32x6xf32>, vector<16x6xf32> -> vector<16x6xf32>
    %cst_103 = arith.constant dense<0.000000e+00> : vector<2x6xf32>
    %302 = tpu.matmul %297, %301, %cst_103 {dimension_numbers = #tpu.dot_dimension_numbers<[1], [0], [0], [1], [0, 0, 1, 1], [], []>} : vector<2x16xf32>, vector<16x6xf32>, vector<2x6xf32> -> vector<2x6xf32>
    %cst_104 = arith.constant dense<0.000000e+00> : vector<2x6xf32>
    %303 = tpu.matmul %298, %299, %cst_104 {dimension_numbers = #tpu.dot_dimension_numbers<[1], [0], [0], [1], [0, 0, 1, 1], [], []>} : vector<2x32xf32>, vector<32x6xf32>, vector<2x6xf32> -> vector<2x6xf32>
    %304 = arith.addf %302, %303 : vector<2x6xf32>
    %c0_105 = arith.constant 0 : index
    %c0_106 = arith.constant 0 : index
    %305 = vector.load %arg11[%c0_105, %c0_106] : memref<2x6xf32, #tpu.memory_space<vmem>>, vector<2x6xf32>
    tpu.vector_store %arg11[%c0_105, %c0_106], %304 {strides = array<i32>} : memref<2x6xf32, #tpu.memory_space<vmem>>, vector<2x6xf32>,
    %c0_107 = arith.constant 0 : index
    %c0_108 = arith.constant 0 : index
    %306 = vector.load %arg12[%c0_107, %c0_108] : memref<2x16xf32, #tpu.memory_space<vmem>>, vector<2x16xf32>
    tpu.vector_store %arg12[%c0_107, %c0_108], %297 {strides = array<i32>} : memref<2x16xf32, #tpu.memory_space<vmem>>, vector<2x16xf32>,
    %c0_109 = arith.constant 0 : index
    %c0_110 = arith.constant 0 : index
    %307 = vector.load %arg13[%c0_109, %c0_110] : memref<16x6xf32, #tpu.memory_space<vmem>>, vector<16x6xf32>
    tpu.vector_store %arg13[%c0_109, %c0_110], %301 {strides = array<i32>} : memref<16x6xf32, #tpu.memory_space<vmem>>, vector<16x6xf32>,
    return
  }
}

</mosaic_0001>

<bundles_post_ra>
// kernel: tpu_custom_call.1
= control target key start
LH: loop header
LB: loop body
LE: loop exit
PB: predicated region body
PF: predicated region fallthrough
CT: control target
= control target key end

     0   :  { %19 = vsyncpa [#allocation4], 0  ;;  %s1386_s0 = inlined_call_operand.vmem [shape: f32[16,32], index: 0, kind: input, shape index: {}]   ;;  %s1387_s1 = inlined_call_operand.vmem [shape: f32[16,1], index: 1, kind: input, shape index: {}]   ;;  %s1388_s2 = inlined_call_operand.vmem [shape: f32[2,32], index: 2, kind: input, shape index: {}]   ;;  %s1389_s3 = inlined_call_operand.vmem [shape: f32[32,6], index: 3, kind: input, shape index: {}]   ;;  %s1390_s4 = inlined_call_operand.vmem [shape: f32[32,96], index: 4, kind: input, shape index: {}]   ;;  %s1391_s5 = inlined_call_operand.hbm [shape: f32[32,96], index: 5, kind: input, shape index: {}]   ;;  %s1392_s6 = inlined_call_operand.vmem [shape: f32[1,96], index: 6, kind: input, shape index: {}]   ;;  %s1393_s7 = inlined_call_operand.vmem [shape: f32[1,96], index: 7, kind: input, shape index: {}]   ;;  %s1394_s8 = inlined_call_operand.hbm [shape: f32[32,48], index: 8, kind: input, shape index: {}]   ;;  %s1395_s9 = inlined_call_operand.hbm [shape: f32[32,48], index: 9, kind: input, shape index: {}]   ;;  %s1396_s10 = inlined_call_operand.hbm [shape: f32[16,32], index: 10, kind: input, shape index: {}]   ;;  %s1397_s11 = inlined_call_operand.hbm [shape: f32[2,6], index: 11, kind: output, shape index: {0}]   ;;  %s1398_s12 = inlined_call_operand.hbm [shape: f32[2,16], index: 12, kind: output, shape index: {1}]   ;;  %s1399_s13 = inlined_call_operand.vmem [shape: f32[16,6], index: 13, kind: output, shape index: {2}]  }
   0x1   :  { %20 = vsyncpa [#allocation7], 0 }
   0x2   :  { %21 = vsyncpa [#allocation10], 0 }
   0x3   :  { %22 = vsyncpa [#allocation5], 0 }
   0x4   :  { %23 = vsyncpa [#allocation13], 0  ;;  %s55_s27 = sshll.u32 %s1394_s8, 4  ;;  %s1128_s28 = smov [#allocation6]   ;;  %s56_s27 = int_to_ptr.hbm [resolvable:$true] %s55_s27 }
   0x5   :  { %s57_s29 = sshll.u32 %s1128_s28, 4  ;;  %s38_s15 = sshll.u32 %s1391_s5, 4  ;;  %s58_s29 = int_to_ptr.vmem [resolvable:$true] %s57_s29  ;;  %s39_s15 = int_to_ptr.hbm [resolvable:$true] %s38_s15 }
   0x6   :  { %s1129_s16 = smov 128   ;;  %s1130_s17 = smov 8  }
   0x7   :  { %63 = dma.hbm_to_vmem [thread:$0]  %s56_s27, 512, %s58_s29, [#allocation7], %s1129_s16, %s1129_s16, %s1130_s17  }
   0x8   :  { %s1131_s18 = smov [#allocation3]   ;;  %s68_s22 = sshll.u32 %s1395_s9, 4  ;;  %s69_s22 = int_to_ptr.hbm [resolvable:$true] %s68_s22 }
   0x9   :  { %s40_s19 = sshll.u32 %s1131_s18, 4  ;;  %s81_s24 = sshll.u32 %s1396_s10, 4  ;;  %s41_s19 = int_to_ptr.vmem [resolvable:$true] %s40_s19  ;;  %s82_s24 = int_to_ptr.hbm [resolvable:$true] %s81_s24 }
   0xa   :  { %46 = dma.hbm_to_vmem [thread:$0]  %s39_s15, 512, %s41_s19, [#allocation4], %s1129_s16, %s1129_s16, %s1130_s17  }
   0xb   :  { %s1132_s25 = smov [#allocation8]   ;;  %s1133_s5 = smov [#allocation9]  }
   0xc   :  { %s70_s26 = sshll.u32 %s1132_s25, 4  ;;  %s83_s27 = sshll.u32 %s1133_s5, 4  ;;  %s71_s26 = int_to_ptr.vmem [resolvable:$true] %s70_s26  ;;  %s84_s27 = int_to_ptr.vmem [resolvable:$true] %s83_s27 }
   0xd   :  { %76 = dma.hbm_to_vmem [thread:$0]  %s69_s22, 512, %s71_s26, [#allocation7], %s1129_s16, %s1129_s16, %s1130_s17  }
   0xe   :  { %89 = dma.hbm_to_vmem [thread:$0]  %s82_s24, 256, %s84_s27, [#allocation10], %s1129_s16, %s1129_s16, %s1130_s17  }
   0xf   :  { %1118 = dma.done.wait [#allocation4], 512  }
  0x10   :  { %1119 = vsyncadd [#allocation4], 4294966784 }
  0x11   :  { %1120 = dma.done.wait [#allocation7], 1024  }
  0x12   :  { %1121 = vsyncadd [#allocation7], 4294966272 }
  0x13   :  { %1122 = dma.done.wait [#allocation10], 256  }
  0x14   :  { %1123 = vsyncadd [#allocation10], 4294967040  ;;  %v1134_v0 = vmov 0   ;;  %v108_v1 = vld [vmem:[%s1387_s1] sm:$0xff]  ;;  %v1226_v2 = vld [vmem:[#allocation3 + $0x18] sm:$0xff]  ;;  %v1135_v9 = vmov 0.0  }
  0x15   :  { %922 = vset.pattern.permute.xlu0 %v1134_v0  ;;  %923 = vset.pattern.permute.xlu2 %v1134_v0  ;;  %v1228_v3 = vld [vmem:[#allocation3 + $0x10] sm:$0xff]  ;;  %v125_v4 = vld [vmem:[%s1390_s4 + $0x18] sm:$0xff]  ;;  %v124_v6 = vld [vmem:[%s1390_s4 + $0x10] sm:$0xff]  ;;  %vm130_vm0 = vcmask 261120   ;;  %s1136_s22 = smov 64   ;;  %vm160_vm1 = vcmask 785408  }
  0x16   :  { %112 = vperm.xlu0 %922, %v108_v1   ;;  %187 = vmatpush.msra.mxu1 %v1226_v2  ;;  %v1234_v5 = vld [vmem:[#allocation3 + $0x8] sm:$0xff]  ;;  %v123_v7 = vld [vmem:[%s1390_s4 + $0x8] sm:$0xff]  ;;  %v1244_v8 = vld [vmem:[#allocation3] sm:$0xff]  ;;  %s1139_s18 = smov [#allocation12]   ;;  %s1140_s21 = smov [#allocation11]  }
  0x17   :  { %149 = vmatpush.msra.mxu0 %v125_v4  ;;  %253 = vmatpush.msra.mxu2 %v1226_v2  ;;  %v122_v10 = vld [vmem:[%s1390_s4] sm:$0xff]  ;;  %s859_s19 = sshll.u32 %s1139_s18, 4  ;;  %s860_s19 = int_to_ptr.vmem [resolvable:$true] %s859_s19 }
  0x18   :  { %188 = vmatpush.msra.mxu1 %v1228_v3  ;;  %905 = vmatpush.msra.mxu3 %v125_v4  ;;  %v106_v11 = vld [vmem:[%s1386_s0] sm:$0xff] }
  0x19   :  { %150 = vmatpush.msra.mxu0 %v124_v6  ;;  %254 = vmatpush.msra.mxu2 %v1228_v3  ;;  %v1281_v14 = vld [vmem:[%s1393_s7] ss:$0 sm:$0xff] }
  0x1a   :  { %189 = vmatpush.msra.mxu1 %v1234_v5  ;;  %906 = vmatpush.msra.mxu3 %v124_v6  ;;  %v1288_v17 = vld [vmem:[%s1392_s6] ss:$0 sm:$0xff]  ;;  %s1137_s6 = smov 96  }
  0x1b   :  { %151 = vmatpush.msra.mxu0 %v123_v7  ;;  %255 = vmatpush.msra.mxu2 %v1234_v5 }
  0x1c   :  { %190 = vmatpush.msra.mxu1 %v1244_v8  ;;  %907 = vmatpush.msra.mxu3 %v123_v7  ;;  %v109_v7 = vld [vmem:[%s1387_s1 + $0x8] sm:$0xff] }
  0x1d   :  { %191 = vmatmul.f32.vlgmr.msra.gmra.mxu1 %v1135_v9  ;;  %256 = vmatpush.msra.mxu2 %v1244_v8 }
  0x1e   :  { %385 = vmatpush.msrb.mxu1 %v1226_v2  ;;  %152 = vmatpush.msra.mxu0 %v122_v10 }
  0x1f   :  { %451 = vmatpush.msrb.mxu2 %v1226_v2  ;;  %908 = vmatpush.msra.mxu3 %v122_v10 }
  0x20   :  { %386 = vmatpush.msrb.mxu1 %v1228_v3  ;;  %583 = vmatpush.msrb.mxu0 %v1226_v2 }
  0x21   :  { %452 = vmatpush.msrb.mxu2 %v1228_v3  ;;  %319 = vmatpush.msrb.mxu3 %v1226_v2 }
  0x22   :  { %387 = vmatpush.msrb.mxu1 %v1234_v5  ;;  %584 = vmatpush.msrb.mxu0 %v1228_v3 }
  0x23   :  { %453 = vmatpush.msrb.mxu2 %v1234_v5  ;;  %320 = vmatpush.msrb.mxu3 %v1228_v3 }
  0x24   :  { %388 = vmatpush.msrb.mxu1 %v1244_v8  ;;  %585 = vmatpush.msrb.mxu0 %v1234_v5 }
  0x25   :  { %454 = vmatpush.msrb.mxu2 %v1244_v8  ;;  %321 = vmatpush.msrb.mxu3 %v1234_v5 }
  0x26   :  { %649 = vmatpush.msra.mxu1 %v1226_v2  ;;  %586 = vmatpush.msrb.mxu0 %v1244_v8 }
  0x27   :  { %322 = vmatpush.msrb.mxu3 %v1244_v8 }
  0x28   :  { %650 = vmatpush.msra.mxu1 %v1228_v3 }
  0x2a   :  { %651 = vmatpush.msra.mxu1 %v1234_v5 }
  0x2c   :  { %652 = vmatpush.msra.mxu1 %v1244_v8 }
  0x88   :  { %v113_v12 = vpop.permute.xlu0 %112 }
  0x89   :  { %v120_v13 = vmul.f32 %v113_v12, %v106_v11 }
  0x8b   :  { %882 = vmatmul.msk.f32.vlgmr.msra.gmra.mxu0 %vm130_vm0, %v120_v13 }
  0x9a   :  { %v192_v15 = vpop.f32.mrf.mxu1 }
  0x9b   :  { %v193_v16 = vadd.f32 %v1281_v14, %v192_v15  ;;  %v107_v15 = vld [vmem:[%s1386_s0 + $0x8] sm:$0xff] }
  0x9d   :  { %216 = vrot.lane.b32.xlu0 %v193_v16, %s1136_s22 }
 0x108   :  { %v154_v18 = vpop.f32.mrf.mxu0 }
 0x109   :  { %v155_v19 = vadd.f32 %v1288_v17, %v154_v18 }
 0x10b   :  { %161 = vst.msk [vmem:[#allocation2] sm:$0xff] %vm160_vm1, %v155_v19 }
 0x10f   :  { %v217_v32 = vpop.permute.xlu0 %216 }
 0x112   :  { %v163_v20 = vld [vmem:[#allocation2] sm:$0x3]  ;;  %v235_v48 = vld [vmem:[#allocation2 + $0x2] sm:$0x3] }
 0x113   :  { %v195_v21 = vadd.f32 %v193_v16, %v163_v20 }
 0x115   :  { %v884_v22 = vmul.f32 -1.442695, %v195_v21 }
 0x117   :  { %926 = vpow2.f32 %v884_v22 }
 0x11d   :  { %v927_v23 = vpop.eup %926 }
 0x11e   :  { %v199_v24 = vadd.f32 1.0, %v927_v23 }
 0x120   :  { %928 = vrcp.f32 %v199_v24  ;;  %v211_v28 = vand.u32 2147483648, %v199_v24  ;;  %v209_v30 = vand.u32 2147483647, %v199_v24  ;;  %vm205_vm3 = vweird.f32 %v199_v24 }
 0x122   :  { %v212_v33 = vor.u32 1.1754944e-38, %v211_v28  ;;  %vm210_vm5 = vcmp.eq.f32.partialorder %v209_v30, 8.507059e+37 }
 0x126   :  { %v929_v25 = vpop.eup %928 }
 0x127   :  { %v201_v26 = vmul.f32 %v929_v25, %v199_v24  ;;  %vm206_vm2 = vweird.f32 %v929_v25 }
 0x128   :  { %vm207_vm4 = vmor %vm205_vm3, %vm206_vm2 }
 0x129   :  { %v202_v27 = vsub.f32 1.0, %v201_v26 }
 0x12b   :  { %v203_v29 = vmul.f32 %v929_v25, %v202_v27 }
 0x12d   :  { %v204_v31 = vadd.f32 %v929_v25, %v203_v29 }
 0x12f   :  { %v208_v34 = vsel %vm207_vm4, %v929_v25, %v204_v31 }
 0x130   :  { %v213_v35 = vsel %vm210_vm5, %v212_v33, %v208_v34 }
 0x131   :  { %v219_v36 = vmul.f32 %v217_v32, %v213_v35  ;;  %v226_v40 = vsub.f32 1.0, %v213_v35  ;;  %v232_v43 = vmul.f32 0.0, %v213_v35 }
 0x133   :  { %221 = vrot.lane.b32.xlu1 %v219_v36, %s1136_s22 }
 0x1a5   :  { %v222_v37 = vpop.permute.xlu1 %221 }
 0x1a6   :  { %v224_v38 = vadd.f32 %v222_v37, %v163_v20 }
 0x1a8   :  { %930 = vtanh.f32 %v224_v38 }
 0x1ae   :  { %v931_v39 = vpop.eup %930 }
 0x1af   :  { %228 = vrot.lane.b32.xlu1 %v931_v39, %s1137_s6 }
 0x221   :  { %v229_v41 = vpop.permute.xlu1 %228 }
 0x222   :  { %v231_v42 = vmul.f32 %v229_v41, %v226_v40 }
 0x224   :  { %v233_v44 = vadd.f32 %v232_v43, %v231_v42 }
 0x226   :  { %237 = vrot.lane.b32.xlu2 %v233_v44, %s1137_s6 }
 0x280   :  { %v238_v45 = vpop.permute.xlu2 %237 }
 0x281   :  { %885 = vmatmul.msk.f32.vlgmr.msra.gmra.mxu2 %vm130_vm0, %v238_v45 }
 0x304   :  { %v258_v46 = vpop.f32.mrf.mxu2 }
 0x305   :  { %v259_v47 = vadd.f32 %v1281_v14, %v258_v46 }
 0x307   :  { %282 = vrot.lane.b32.xlu2 %v259_v47, %s1136_s22  ;;  %v261_v49 = vadd.f32 %v259_v47, %v235_v48  ;;  %v367_v47 = vld [vmem:[#allocation2 + $0x6] sm:$0x3] }
 0x309   :  { %v886_v50 = vmul.f32 -1.442695, %v261_v49 }
 0x30b   :  { %932 = vpow2.f32 %v886_v50 }
 0x30f   :  { %117 = vperm.xlu2 %923, %v109_v7  }
 0x311   :  { %v933_v51 = vpop.eup %932 }
 0x312   :  { %v265_v52 = vadd.f32 1.0, %v933_v51 }
 0x314   :  { %934 = vrcp.f32 %v265_v52  ;;  %v277_v58 = vand.u32 2147483648, %v265_v52  ;;  %vm271_vm7 = vweird.f32 %v265_v52  ;;  %v275_v59 = vand.u32 2147483647, %v265_v52 }
 0x316   :  { %v278_v61 = vor.u32 1.1754944e-38, %v277_v58  ;;  %vm276_vm9 = vcmp.eq.f32.partialorder %v275_v59, 8.507059e+37 }
 0x31a   :  { %v935_v53 = vpop.eup %934 }
 0x31b   :  { %v267_v54 = vmul.f32 %v935_v53, %v265_v52  ;;  %vm272_vm6 = vweird.f32 %v935_v53 }
 0x31c   :  { %vm273_vm8 = vmor %vm271_vm7, %vm272_vm6 }
 0x31d   :  { %v268_v55 = vsub.f32 1.0, %v267_v54 }
 0x31f   :  { %v269_v56 = vmul.f32 %v935_v53, %v268_v55 }
 0x321   :  { %v270_v57 = vadd.f32 %v935_v53, %v269_v56 }
 0x323   :  { %v274_v60 = vsel %vm273_vm8, %v935_v53, %v270_v57 }
 0x324   :  { %v279_v63 = vsel %vm276_vm9, %v278_v61, %v274_v60 }
 0x325   :  { %v292_v9 = vsub.f32 1.0, %v279_v63  ;;  %v298_v11 = vmul.f32 %v279_v63, %v233_v44 }
 0x361   :  { %v283_v62 = vpop.permute.xlu2 %282 }
 0x362   :  { %v285_v0 = vmul.f32 %v283_v62, %v279_v63 }
 0x364   :  { %287 = vrot.lane.b32.xlu0 %v285_v0, %s1136_s22 }
 0x369   :  { %v118_v16 = vpop.permute.xlu2 %117 }
 0x36a   :  { %v121_v18 = vmul.f32 %v118_v16, %v107_v15 }
 0x36c   :  { %883 = vmatmul.msk.f32.vlgmr.msra.gmra.mxu3 %vm130_vm0, %v121_v18 }
 0x36d   :  { %517 = vmatpush.msra.mxu3 %v1226_v2  ;;  %v301_v2 = vld [vmem:[#allocation2 + $0x4] sm:$0x3] }
 0x36f   :  { %518 = vmatpush.msra.mxu3 %v1228_v3 }
 0x371   :  { %519 = vmatpush.msra.mxu3 %v1234_v5 }
 0x373   :  { %520 = vmatpush.msra.mxu3 %v1244_v8 }
 0x3d6   :  { %v288_v1 = vpop.permute.xlu0 %287 }
 0x3d7   :  { %v290_v4 = vadd.f32 %v288_v1, %v235_v48 }
 0x3d9   :  { %936 = vtanh.f32 %v290_v4 }
 0x3df   :  { %v937_v6 = vpop.eup %936 }
 0x3e0   :  { %294 = vrot.lane.b32.xlu1 %v937_v6, %s1137_s6 }
 0x3ef   :  { %v157_v20 = vpop.f32.mrf.mxu3 }
 0x3f0   :  { %v158_v21 = vadd.f32 %v1288_v17, %v157_v20 }
 0x3f2   :  { %162 = vst.msk [vmem:[#allocation2 + $0x8] sm:$0xff] %vm160_vm1, %v158_v21 }
 0x3f9   :  { %v433_v16 = vld [vmem:[#allocation2 + $0x8] sm:$0x3] }
 0x452   :  { %v295_v10 = vpop.permute.xlu1 %294 }
 0x453   :  { %v297_v12 = vmul.f32 %v295_v10, %v292_v9 }
 0x455   :  { %v299_v13 = vadd.f32 %v298_v11, %v297_v12 }
 0x457   :  { %303 = vrot.lane.b32.xlu0 %v299_v13, %s1137_s6 }
 0x4c9   :  { %v304_v19 = vpop.permute.xlu0 %303 }
 0x4ca   :  { %887 = vmatmul.msk.f32.vlgmr.msrb.gmra.mxu3 %vm130_vm0, %v304_v19 }
 0x54d   :  { %v324_v22 = vpop.f32.mrf.mxu3 }
 0x54e   :  { %v325_v23 = vadd.f32 %v1281_v14, %v324_v22 }
 0x550   :  { %348 = vrot.lane.b32.xlu1 %v325_v23, %s1136_s22  ;;  %v327_v24 = vadd.f32 %v325_v23, %v301_v2 }
 0x552   :  { %v888_v3 = vmul.f32 -1.442695, %v327_v24 }
 0x554   :  { %938 = vpow2.f32 %v888_v3 }
 0x55a   :  { %v939_v5 = vpop.eup %938 }
 0x55b   :  { %v331_v25 = vadd.f32 1.0, %v939_v5 }
 0x55d   :  { %940 = vrcp.f32 %v331_v25  ;;  %v343_v17 = vand.u32 2147483648, %v331_v25  ;;  %vm337_vm11 = vweird.f32 %v331_v25  ;;  %v341_v30 = vand.u32 2147483647, %v331_v25 }
 0x55f   :  { %v344_v32 = vor.u32 1.1754944e-38, %v343_v17  ;;  %vm342_vm13 = vcmp.eq.f32.partialorder %v341_v30, 8.507059e+37 }
 0x563   :  { %v941_v8 = vpop.eup %940 }
 0x564   :  { %v333_v26 = vmul.f32 %v941_v8, %v331_v25  ;;  %vm338_vm10 = vweird.f32 %v941_v8 }
 0x565   :  { %vm339_vm12 = vmor %vm337_vm11, %vm338_vm10 }
 0x566   :  { %v334_v27 = vsub.f32 1.0, %v333_v26 }
 0x568   :  { %v335_v28 = vmul.f32 %v941_v8, %v334_v27 }
 0x56a   :  { %v336_v29 = vadd.f32 %v941_v8, %v335_v28 }
 0x56c   :  { %v340_v31 = vsel %vm339_vm12, %v941_v8, %v336_v29 }
 0x56d   :  { %v345_v34 = vsel %vm342_vm13, %v344_v32, %v340_v31 }
 0x56e   :  { %v358_v39 = vsub.f32 1.0, %v345_v34  ;;  %v364_v41 = vmul.f32 %v345_v34, %v299_v13 }
 0x5c2   :  { %v349_v33 = vpop.permute.xlu1 %348 }
 0x5c3   :  { %v351_v35 = vmul.f32 %v349_v33, %v345_v34 }
 0x5c5   :  { %353 = vrot.lane.b32.xlu2 %v351_v35, %s1136_s22 }
 0x61f   :  { %v354_v36 = vpop.permute.xlu2 %353 }
 0x620   :  { %v356_v37 = vadd.f32 %v354_v36, %v301_v2 }
 0x622   :  { %942 = vtanh.f32 %v356_v37 }
 0x628   :  { %v943_v38 = vpop.eup %942 }
 0x629   :  { %360 = vrot.lane.b32.xlu0 %v943_v38, %s1137_s6 }
 0x69b   :  { %v361_v40 = vpop.permute.xlu0 %360 }
 0x69c   :  { %v363_v42 = vmul.f32 %v361_v40, %v358_v39  ;;  %v499_v40 = vld [vmem:[#allocation2 + $0xa] sm:$0x3] }
 0x69e   :  { %v365_v43 = vadd.f32 %v364_v41, %v363_v42 }
 0x6a0   :  { %369 = vrot.lane.b32.xlu1 %v365_v43, %s1137_s6 }
 0x712   :  { %v370_v44 = vpop.permute.xlu1 %369 }
 0x713   :  { %889 = vmatmul.msk.f32.vlgmr.msrb.gmra.mxu1 %vm130_vm0, %v370_v44 }
 0x790   :  { %v390_v45 = vpop.f32.mrf.mxu1 }
 0x791   :  { %v391_v46 = vadd.f32 %v1281_v14, %v390_v45 }
 0x793   :  { %414 = vrot.lane.b32.xlu2 %v391_v46, %s1136_s22  ;;  %v393_v48 = vadd.f32 %v391_v46, %v367_v47 }
 0x795   :  { %v890_v49 = vmul.f32 -1.442695, %v393_v48 }
 0x797   :  { %944 = vpow2.f32 %v890_v49 }
 0x79d   :  { %v945_v50 = vpop.eup %944 }
 0x79e   :  { %v397_v51 = vadd.f32 1.0, %v945_v50 }
 0x7a0   :  { %946 = vrcp.f32 %v397_v51  ;;  %v409_v57 = vand.u32 2147483648, %v397_v51  ;;  %vm403_vm15 = vweird.f32 %v397_v51  ;;  %v407_v58 = vand.u32 2147483647, %v397_v51 }
 0x7a2   :  { %v410_v60 = vor.u32 1.1754944e-38, %v409_v57  ;;  %vm408_vm2 = vcmp.eq.f32.partialorder %v407_v58, 8.507059e+37 }
 0x7a6   :  { %v947_v52 = vpop.eup %946 }
 0x7a7   :  { %v399_v53 = vmul.f32 %v947_v52, %v397_v51  ;;  %vm404_vm14 = vweird.f32 %v947_v52 }
 0x7a8   :  { %vm405_vm1 = vmor %vm403_vm15, %vm404_vm14 }
 0x7a9   :  { %v400_v54 = vsub.f32 1.0, %v399_v53 }
 0x7ab   :  { %v401_v55 = vmul.f32 %v947_v52, %v400_v54 }
 0x7ad   :  { %v402_v56 = vadd.f32 %v947_v52, %v401_v55 }
 0x7af   :  { %v406_v59 = vsel %vm405_vm1, %v947_v52, %v402_v56 }
 0x7b0   :  { %v411_v62 = vsel %vm408_vm2, %v410_v60, %v406_v59 }
 0x7b1   :  { %v424_v6 = vsub.f32 1.0, %v411_v62  ;;  %v430_v9 = vmul.f32 %v411_v62, %v365_v43 }
 0x7ed   :  { %v415_v61 = vpop.permute.xlu2 %414 }
 0x7ee   :  { %v417_v63 = vmul.f32 %v415_v61, %v411_v62 }
 0x7f0   :  { %419 = vrot.lane.b32.xlu0 %v417_v63, %s1136_s22 }
 0x862   :  { %v420_v0 = vpop.permute.xlu0 %419 }
 0x863   :  { %v422_v1 = vadd.f32 %v420_v0, %v367_v47 }
 0x865   :  { %948 = vtanh.f32 %v422_v1 }
 0x86b   :  { %v949_v4 = vpop.eup %948 }
 0x86c   :  { %426 = vrot.lane.b32.xlu1 %v949_v4, %s1137_s6 }
 0x8de   :  { %v427_v7 = vpop.permute.xlu1 %426 }
 0x8df   :  { %v429_v10 = vmul.f32 %v427_v7, %v424_v6  ;;  %v565_v7 = vld [vmem:[#allocation2 + $0xc] sm:$0x3] }
 0x8e1   :  { %v431_v11 = vadd.f32 %v430_v9, %v429_v10 }
 0x8e3   :  { %435 = vrot.lane.b32.xlu2 %v431_v11, %s1137_s6 }
 0x93d   :  { %v436_v12 = vpop.permute.xlu2 %435 }
 0x93e   :  { %891 = vmatmul.msk.f32.vlgmr.msrb.gmra.mxu2 %vm130_vm0, %v436_v12 }
 0x9c1   :  { %v456_v13 = vpop.f32.mrf.mxu2 }
 0x9c2   :  { %v457_v15 = vadd.f32 %v1281_v14, %v456_v13 }
 0x9c4   :  { %480 = vrot.lane.b32.xlu0 %v457_v15, %s1136_s22  ;;  %v459_v18 = vadd.f32 %v457_v15, %v433_v16 }
 0x9c6   :  { %v892_v19 = vmul.f32 -1.442695, %v459_v18 }
 0x9c8   :  { %950 = vpow2.f32 %v892_v19 }
 0x9ce   :  { %v951_v20 = vpop.eup %950 }
 0x9cf   :  { %v463_v21 = vadd.f32 1.0, %v951_v20 }
 0x9d1   :  { %952 = vrcp.f32 %v463_v21  ;;  %v475_v5 = vand.u32 2147483648, %v463_v21  ;;  %vm469_vm4 = vweird.f32 %v463_v21  ;;  %v473_v25 = vand.u32 2147483647, %v463_v21 }
 0x9d3   :  { %v476_v26 = vor.u32 1.1754944e-38, %v475_v5  ;;  %vm474_vm6 = vcmp.eq.f32.partialorder %v473_v25, 8.507059e+37 }
 0x9d7   :  { %v953_v22 = vpop.eup %952 }
 0x9d8   :  { %v465_v23 = vmul.f32 %v953_v22, %v463_v21  ;;  %vm470_vm3 = vweird.f32 %v953_v22 }
 0x9d9   :  { %vm471_vm5 = vmor %vm469_vm4, %vm470_vm3  ;;  %vm840_vm4 = vcmask 48128  }
 0x9da   :  { %v466_v2 = vsub.f32 1.0, %v465_v23 }
 0x9dc   :  { %v467_v24 = vmul.f32 %v953_v22, %v466_v2 }
 0x9de   :  { %v468_v3 = vadd.f32 %v953_v22, %v467_v24 }
 0x9e0   :  { %v472_v8 = vsel %vm471_vm5, %v953_v22, %v468_v3  ;;  %vm813_vm5 = vcmask 130048  }
 0x9e1   :  { %v477_v28 = vsel %vm474_vm6, %v476_v26, %v472_v8  ;;  %vm838_vm6 = vcmask 123904  }
 0x9e2   :  { %v490_v32 = vsub.f32 1.0, %v477_v28  ;;  %v496_v34 = vmul.f32 %v477_v28, %v431_v11 }
 0xa36   :  { %v481_v27 = vpop.permute.xlu0 %480 }
 0xa37   :  { %v483_v29 = vmul.f32 %v481_v27, %v477_v28 }
 0xa39   :  { %485 = vrot.lane.b32.xlu1 %v483_v29, %s1136_s22 }
 0xaab   :  { %v486_v17 = vpop.permute.xlu1 %485 }
 0xaac   :  { %v488_v30 = vadd.f32 %v486_v17, %v433_v16 }
 0xaae   :  { %954 = vtanh.f32 %v488_v30 }
 0xab4   :  { %v955_v31 = vpop.eup %954 }
 0xab5   :  { %492 = vrot.lane.b32.xlu2 %v955_v31, %s1137_s6 }
 0xb0f   :  { %v493_v33 = vpop.permute.xlu2 %492 }
 0xb10   :  { %v495_v35 = vmul.f32 %v493_v33, %v490_v32  ;;  %v631_v33 = vld [vmem:[#allocation2 + $0xe] sm:$0x3] }
 0xb12   :  { %v497_v36 = vadd.f32 %v496_v34, %v495_v35 }
 0xb14   :  { %501 = vrot.lane.b32.xlu0 %v497_v36, %s1137_s6 }
 0xb86   :  { %v502_v37 = vpop.permute.xlu0 %501 }
 0xb87   :  { %893 = vmatmul.msk.f32.vlgmr.msra.gmra.mxu3 %vm130_vm0, %v502_v37 }
 0xc0a   :  { %v522_v38 = vpop.f32.mrf.mxu3 }
 0xc0b   :  { %v523_v39 = vadd.f32 %v1281_v14, %v522_v38 }
 0xc0d   :  { %546 = vrot.lane.b32.xlu1 %v523_v39, %s1136_s22  ;;  %v525_v41 = vadd.f32 %v523_v39, %v499_v40 }
 0xc0f   :  { %v894_v42 = vmul.f32 -1.442695, %v525_v41 }
 0xc11   :  { %956 = vpow2.f32 %v894_v42 }
 0xc17   :  { %v957_v43 = vpop.eup %956 }
 0xc18   :  { %v529_v44 = vadd.f32 1.0, %v957_v43 }
 0xc1a   :  { %958 = vrcp.f32 %v529_v44  ;;  %v541_v50 = vand.u32 2147483648, %v529_v44  ;;  %vm535_vm8 = vweird.f32 %v529_v44  ;;  %v539_v51 = vand.u32 2147483647, %v529_v44 }
 0xc1c   :  { %v542_v53 = vor.u32 1.1754944e-38, %v541_v50  ;;  %vm540_vm10 = vcmp.eq.f32.partialorder %v539_v51, 8.507059e+37 }
 0xc20   :  { %v959_v45 = vpop.eup %958 }
 0xc21   :  { %v531_v46 = vmul.f32 %v959_v45, %v529_v44  ;;  %vm536_vm7 = vweird.f32 %v959_v45 }
 0xc22   :  { %vm537_vm9 = vmor %vm535_vm8, %vm536_vm7  ;;  %vm836_vm7 = vcmask 41984  }
 0xc23   :  { %v532_v47 = vsub.f32 1.0, %v531_v46 }
 0xc25   :  { %v533_v48 = vmul.f32 %v959_v45, %v532_v47 }
 0xc27   :  { %v534_v49 = vadd.f32 %v959_v45, %v533_v48 }
 0xc29   :  { %v538_v52 = vsel %vm537_vm9, %v959_v45, %v534_v49 }
 0xc2a   :  { %v543_v55 = vsel %vm540_vm10, %v542_v53, %v538_v52  ;;  %v756_v52 = vld [vmem:[%s1389_s3 + $0x18] sm:$0xff]  ;;  %v704_v53 = vld [vmem:[#allocation8 + $0x18] sm:$0xff] }
 0xc2b   :  { %v556_v60 = vsub.f32 1.0, %v543_v55  ;;  %v562_v62 = vmul.f32 %v543_v55, %v497_v36  ;;  %777 = vmatpush.msra.mxu0 %v756_v52  ;;  %722 = vmatpush.msra.mxu2 %v704_v53 }
 0xc2c   :  { %805 = vmatpush.msrb.mxu1 %v756_v52 }
 0xc7f   :  { %v547_v54 = vpop.permute.xlu1 %546 }
 0xc80   :  { %v549_v56 = vmul.f32 %v547_v54, %v543_v55  ;;  %v700_v54 = vld [vmem:[#allocation6 + $0x18] sm:$0xff]  ;;  %v755_v55 = vld [vmem:[%s1389_s3 + $0x10] sm:$0xff] }
 0xc81   :  { %745 = vmatpush.msrb.mxu3 %v700_v54  ;;  %778 = vmatpush.msra.mxu0 %v755_v55 }
 0xc82   :  { %551 = vrot.lane.b32.xlu2 %v549_v56, %s1136_s22  ;;  %v703_v56 = vld [vmem:[#allocation8 + $0x10] sm:$0xff]  ;;  %806 = vmatpush.msrb.mxu1 %v755_v55 }
 0xc83   :  { %723 = vmatpush.msra.mxu2 %v703_v56 }
 0xcdc   :  { %v552_v57 = vpop.permute.xlu2 %551 }
 0xcdd   :  { %v554_v58 = vadd.f32 %v552_v57, %v499_v40  ;;  %v699_v57 = vld [vmem:[#allocation6 + $0x10] sm:$0xff] }
 0xcde   :  { %746 = vmatpush.msrb.mxu3 %v699_v57 }
 0xcdf   :  { %960 = vtanh.f32 %v554_v58  ;;  %v754_v58 = vld [vmem:[%s1389_s3 + $0x8] sm:$0xff] }
 0xce0   :  { %779 = vmatpush.msra.mxu0 %v754_v58  ;;  %807 = vmatpush.msrb.mxu1 %v754_v58 }
 0xce5   :  { %v961_v59 = vpop.eup %960 }
 0xce6   :  { %558 = vrot.lane.b32.xlu0 %v961_v59, %s1137_s6  ;;  %v702_v59 = vld [vmem:[#allocation8 + $0x8] sm:$0xff] }
 0xce7   :  { %724 = vmatpush.msra.mxu2 %v702_v59 }
 0xd58   :  { %v559_v61 = vpop.permute.xlu0 %558 }
 0xd59   :  { %v561_v63 = vmul.f32 %v559_v61, %v556_v60  ;;  %v698_v60 = vld [vmem:[#allocation6 + $0x8] sm:$0xff]  ;;  %v753_v61 = vld [vmem:[%s1389_s3] sm:$0xff] }
 0xd5a   :  { %747 = vmatpush.msrb.mxu3 %v698_v60  ;;  %780 = vmatpush.msra.mxu0 %v753_v61 }
 0xd5b   :  { %v563_v0 = vadd.f32 %v562_v62, %v561_v63  ;;  %v701_v62 = vld [vmem:[#allocation8] sm:$0xff]  ;;  %808 = vmatpush.msrb.mxu1 %v753_v61 }
 0xd5c   :  { %v757_v63 = vld [vmem:[#allocation9] sm:$0xff]  ;;  %725 = vmatpush.msra.mxu2 %v701_v62 }
 0xd5d   :  { %567 = vrot.lane.b32.xlu1 %v563_v0, %s1137_s6 }
 0xdcf   :  { %v568_v1 = vpop.permute.xlu1 %567 }
 0xdd0   :  { %895 = vmatmul.msk.f32.vlgmr.msrb.gmra.mxu0 %vm130_vm0, %v568_v1 }
 0xdd8   :  { %901 = vmatmul.msk.f32.vlgmr.msra.gmra.mxu0 %vm130_vm0, %v757_v63 }
 0xe4d   :  { %v588_v4 = vpop.f32.mrf.mxu0 }
 0xe4e   :  { %v589_v6 = vadd.f32 %v1281_v14, %v588_v4 }
 0xe50   :  { %612 = vrot.lane.b32.xlu2 %v589_v6, %s1136_s22  ;;  %v591_v9 = vadd.f32 %v589_v6, %v565_v7 }
 0xe52   :  { %v896_v10 = vmul.f32 -1.442695, %v591_v9 }
 0xe54   :  { %962 = vpow2.f32 %v896_v10  ;;  %v696_v10 = vld [vmem:[%s1388_s2] sm:$0x3]  ;;  %s1138_s2 = smov 112  }
 0xe5a   :  { %v963_v11 = vpop.eup %962 }
 0xe5b   :  { %v595_v12 = vadd.f32 1.0, %v963_v11  ;;  %v758_v11 = vld [vmem:[#allocation9 + $0x8] sm:$0xff] }
 0xe5c   :  { %902 = vmatmul.msk.f32.gmra.mxu0 %vm130_vm0, %v758_v11 }
 0xe5d   :  { %964 = vrcp.f32 %v595_v12  ;;  %v607_v20 = vand.u32 2147483648, %v595_v12  ;;  %vm601_vm12 = vweird.f32 %v595_v12  ;;  %v605_v21 = vand.u32 2147483647, %v595_v12 }
 0xe5f   :  { %v608_v23 = vor.u32 1.1754944e-38, %v607_v20  ;;  %vm606_vm14 = vcmp.eq.f32.partialorder %v605_v21, 8.507059e+37 }
 0xe63   :  { %v965_v13 = vpop.eup %964 }
 0xe64   :  { %v597_v15 = vmul.f32 %v965_v13, %v595_v12  ;;  %vm602_vm11 = vweird.f32 %v965_v13  ;;  %v782_v12 = vpop.f32.mrf.mxu0 }
 0xe65   :  { %vm603_vm13 = vmor %vm601_vm12, %vm602_vm11  ;;  %841 = vst.msk [vmem:[%s1399_s13] sm:$0xff] %vm840_vm4, %v782_v12 }
 0xe66   :  { %v598_v16 = vsub.f32 1.0, %v597_v15 }
 0xe68   :  { %v599_v18 = vmul.f32 %v965_v13, %v598_v16 }
 0xe6a   :  { %v600_v19 = vadd.f32 %v965_v13, %v599_v18 }
 0xe6c   :  { %v604_v22 = vsel %vm603_vm13, %v965_v13, %v600_v19 }
 0xe6d   :  { %v609_v24 = vsel %vm606_vm14, %v608_v23, %v604_v22 }
 0xe6e   :  { %v622_v26 = vsub.f32 1.0, %v609_v24  ;;  %v628_v28 = vmul.f32 %v609_v24, %v563_v0  ;;  %v697_v0 = vld [vmem:[#allocation6] sm:$0xff] }
 0xe6f   :  { %748 = vmatpush.msrb.mxu3 %v697_v0 }
 0xe70   :  { %900 = vmatmul.msk.f32.vlgmr.msrb.gmra.mxu3 %vm130_vm0, %v696_v10 }
 0xeaa   :  { %v613_v2 = vpop.permute.xlu2 %612 }
 0xeab   :  { %v615_v3 = vmul.f32 %v613_v2, %v609_v24 }
 0xead   :  { %617 = vrot.lane.b32.xlu0 %v615_v3, %s1136_s22 }
 0xed9   :  { %v785_v15 = vpop.f32.mrf.mxu0 }
 0xeda   :  { %842 = vst.msk [vmem:[%s1399_s13 + $0x8] sm:$0xff] %vm840_vm4, %v785_v15  ;;  %830 = vmatpush.msrb.mxu2 %v785_v15  ;;  %s861_s13 = sshll.u32 %s1398_s12, 4  ;;  %s862_s13 = int_to_ptr.hbm [resolvable:$true] %s861_s13 }
 0xedc   :  { %831 = vmatpush.msrb.mxu2 %v782_v12 }
 0xef3   :  { %v750_v16 = vpop.f32.mrf.mxu3 }
 0xf1f   :  { %v618_v5 = vpop.permute.xlu0 %617 }
 0xf20   :  { %v620_v25 = vadd.f32 %v618_v5, %v565_v7 }
 0xf22   :  { %966 = vtanh.f32 %v620_v25 }
 0xf28   :  { %v967_v8 = vpop.eup %966 }
 0xf29   :  { %624 = vrot.lane.b32.xlu1 %v967_v8, %s1137_s6 }
 0xf9b   :  { %v625_v27 = vpop.permute.xlu1 %624 }
 0xf9c   :  { %v627_v29 = vmul.f32 %v625_v27, %v622_v26 }
 0xf9e   :  { %v1343_v17 = vadd.f32 %v628_v28, %v627_v29 }
 0xfa0   :  { %633 = vrot.lane.b32.xlu2 %v1343_v17, %s1137_s6 }
 0xffa   :  { %v634_v30 = vpop.permute.xlu2 %633 }
 0xffb   :  { %897 = vmatmul.msk.f32.vlgmr.msra.gmra.mxu1 %vm130_vm0, %v634_v30 }
0x1078   :  { %v654_v31 = vpop.f32.mrf.mxu1 }
0x1079   :  { %v655_v32 = vadd.f32 %v1281_v14, %v654_v31 }
0x107b   :  { %678 = vrot.lane.b32.xlu0 %v655_v32, %s1136_s22  ;;  %v657_v34 = vadd.f32 %v655_v32, %v631_v33 }
0x107d   :  { %v898_v35 = vmul.f32 -1.442695, %v657_v34 }
0x107f   :  { %968 = vpow2.f32 %v898_v35 }
0x1085   :  { %v969_v36 = vpop.eup %968 }
0x1086   :  { %v661_v37 = vadd.f32 1.0, %v969_v36 }
0x1088   :  { %970 = vrcp.f32 %v661_v37  ;;  %v673_v43 = vand.u32 2147483648, %v661_v37  ;;  %vm667_vm1 = vweird.f32 %v661_v37  ;;  %v671_v44 = vand.u32 2147483647, %v661_v37 }
0x108a   :  { %v674_v45 = vor.u32 1.1754944e-38, %v673_v43  ;;  %vm672_vm3 = vcmp.eq.f32.partialorder %v671_v44, 8.507059e+37 }
0x108e   :  { %v971_v38 = vpop.eup %970 }
0x108f   :  { %v663_v39 = vmul.f32 %v971_v38, %v661_v37  ;;  %vm668_vm15 = vweird.f32 %v971_v38 }
0x1090   :  { %vm669_vm2 = vmor %vm667_vm1, %vm668_vm15 }
0x1091   :  { %v664_v40 = vsub.f32 1.0, %v663_v39 }
0x1093   :  { %v665_v41 = vmul.f32 %v971_v38, %v664_v40 }
0x1095   :  { %v666_v42 = vadd.f32 %v971_v38, %v665_v41 }
0x1097   :  { %v670_v14 = vsel %vm669_vm2, %v971_v38, %v666_v42 }
0x1098   :  { %v675_v47 = vsel %vm672_vm3, %v674_v45, %v670_v14 }
0x1099   :  { %v688_v1 = vsub.f32 1.0, %v675_v47  ;;  %v694_v6 = vmul.f32 %v675_v47, %v1343_v17 }
0x10ed   :  { %v679_v46 = vpop.permute.xlu0 %678 }
0x10ee   :  { %v681_v48 = vmul.f32 %v679_v46, %v675_v47 }
0x10f0   :  { %683 = vrot.lane.b32.xlu1 %v681_v48, %s1136_s22  ;;  %s848_s22 = sshll.u32 %s1140_s21, 4  ;;  %s849_s22 = int_to_ptr.vmem [resolvable:$true] %s848_s22 }
0x1162   :  { %v684_v49 = vpop.permute.xlu1 %683 }
0x1163   :  { %v686_v50 = vadd.f32 %v684_v49, %v631_v33 }
0x1165   :  { %972 = vtanh.f32 %v686_v50 }
0x116b   :  { %v973_v51 = vpop.eup %972 }
0x116c   :  { %690 = vrot.lane.b32.xlu2 %v973_v51, %s1137_s6 }
0x11c6   :  { %v691_v4 = vpop.permute.xlu2 %690 }
0x11c7   :  { %v693_v7 = vmul.f32 %v691_v4, %v688_v1 }
0x11c9   :  { %v695_v9 = vadd.f32 %v694_v6, %v693_v7 }
0x11cb   :  { %706 = vrot.lane.b32.xlu0 %v695_v9, %s1137_s6  ;;  %s850_s6 = sshll.u32 %s1397_s11, 4  ;;  %s851_s6 = int_to_ptr.hbm [resolvable:$true] %s850_s6 }
0x123d   :  { %v707_v13 = vpop.permute.xlu0 %706 }
0x123e   :  { %899 = vmatmul.msk.f32.vlgmr.msra.gmra.mxu2 %vm130_vm0, %v707_v13 }
0x12c1   :  { %v727_v18 = vpop.f32.mrf.mxu2 }
0x12c2   :  { %v751_v19 = vadd.f32 %v750_v16, %v727_v18 }
0x12c4   :  { %789 = vrot.lane.b32.xlu1 %v751_v19, %s1138_s2  ;;  %904 = vmatmul.msk.f32.vlgmr.msrb.gmra.mxu2 %vm813_vm5, %v751_v19  ;;  %839 = vst.msk [vmem:[#allocation12] sm:$0x3] %vm838_vm6, %v751_v19 }
0x12c5   :  { %864 = dma.vmem_to_hbm [thread:$0]  %s860_s19, 32, %s862_s13, [#allocation13]  }
0x1336   :  { %v790_v20 = vpop.permute.xlu1 %789 }
0x1337   :  { %903 = vmatmul.msk.f32.vlgmr.msrb.gmra.mxu1 %vm130_vm0, %v790_v20 }
0x1347   :  { %v833_v21 = vpop.f32.mrf.mxu2 }
0x13b4   :  { %v810_v22 = vpop.f32.mrf.mxu1 }
0x13b5   :  { %v834_v23 = vadd.f32 %v833_v21, %v810_v22 }
0x13b7   :  { %837 = vst.msk [vmem:[#allocation11] sm:$0x3] %vm836_vm7, %v834_v23 }
0x13b8   :  { %853 = dma.vmem_to_hbm [thread:$0]  %s849_s22, 32, %s851_s6, [#allocation5]  }
0x13b9   :  { %1124 = dma.done.wait [#allocation5], 32  }
0x13ba   :  { %1125 = vsyncadd [#allocation5], 4294967264 }
0x13bb   :  { %1126 = dma.done.wait [#allocation13], 32  }
0x13bc   :  { %1127 = vsyncadd [#allocation13], 4294967264 }
0x13bd   :  { %877 = vsyncpa [#allocation4], 1 }
0x13be   :  { %878 = vsyncpa [#allocation7], 1 }
0x13bf   :  { %879 = vsyncpa [#allocation10], 1 }
0x13c0   :  { %880 = vsyncpa [#allocation5], 1 }
0x13c1   :  { %881 = vsyncpa [#allocation13], 1 }

</bundles_post_ra>
